<compile_context>
chip_gen: v7x
topology: tpu7x:2x2x1
jax: 0.10.0
libtpu: 0.0.40
codegen_flags: <defaults>
</compile_context>

<pallas_src>
import jax
import jax.numpy as jnp
from jax.experimental import pallas as pl
from jax.experimental.pallas import tpu as pltpu


def _residual_ff_kernel(x_ref, w1_ref, b1_ref, w2_ref, b2_ref, o_ref):
    """One [TM, D] token tile: o = GELU(x @ W1 + b1) @ W2 + b2 + x."""
    x = x_ref[...]                                           # [TM, D] native dtype (MXU operand)
    h = jnp.dot(x, w1_ref[...], preferred_element_type=jnp.float32)
    h = h + b1_ref[...].astype(jnp.float32)                  # (1, H) broadcast, f32 accumulator
    # NOTE: jax.nn.gelu default is the tanh approximation; PyTorch nn.GELU
    # defaults to exact erf (difference ~1e-3).
    # TODO(synk): switch to approximate=False for bit-exact torch parity once
    # erf lowering is guaranteed on the target Mosaic version.
    h = jax.nn.gelu(h)
    y = jnp.dot(h.astype(w2_ref.dtype), w2_ref[...],         # keep MXU operands in weight dtype
                preferred_element_type=jnp.float32)
    y = y + b2_ref[...].astype(jnp.float32)
    o_ref[...] = (y + x.astype(jnp.float32)).astype(o_ref.dtype)  # fused residual, single cast


def residual_feedforward(x, w1, b1, w2, b2, *, block_tokens=256):
    """x: [N, D]; w1: [D, H]; b1: [1, H]; w2: [H, D]; b2: [1, D]."""
    n, d = x.shape
    d2, h = w1.shape
    assert d2 == d and w2.shape == (h, d)
    assert b1.shape == (1, h) and b2.shape == (1, d)

    # Token tile: multiple of 8 sublanes (256 default aligns with the 256x256
    # MXU on v6e/v7x); fall back to the full token extent for small inputs.
    tm = min(block_tokens, n)
    grid = (pl.cdiv(n, tm),)

    nbytes = lambda a: a.size * a.dtype.itemsize
    cost = pl.CostEstimate(
        flops=4 * n * d * h,                       # two matmuls, 2*N*D*H flops each
        transcendentals=n * h,                     # GELU nonlinearity
        bytes_accessed=2 * nbytes(x) + nbytes(w1) + nbytes(w2)
        + nbytes(b1) + nbytes(b2),
    )

    # VMEM budget: resident weights (count 2x for safety) + double-buffered
    # x/o tiles + f32 intermediate; 2x headroom, clamped to [16, 48] MiB so it
    # stays below v7x's 64 MiB physical VMEM while exceeding the default
    # scoped limit when needed.
    act_bytes = x.dtype.itemsize
    vmem_needed = (
        2 * (nbytes(w1) + nbytes(w2) + nbytes(b1) + nbytes(b2))
        + 4 * tm * d * act_bytes                   # 2x-buffered x and o tiles
        + 2 * tm * h * 4                           # f32 intermediate / accumulator slack
    )
    vmem_limit = int(min(max(2 * vmem_needed, 16 << 20), 48 << 20))

    return pl.pallas_call(
        _residual_ff_kernel,
        out_shape=jax.ShapeDtypeStruct((n, d), x.dtype),
        grid_spec=pltpu.PrefetchScalarGridSpec(
            num_scalar_prefetch=0,
            grid=grid,
            in_specs=[
                pl.BlockSpec((tm, d), lambda i: (i, 0)),   # x: tiled over tokens
                pl.BlockSpec((d, h), lambda i: (0, 0)),    # W1: VMEM-resident
                pl.BlockSpec((1, h), lambda i: (0, 0)),    # b1
                pl.BlockSpec((h, d), lambda i: (0, 0)),    # W2: VMEM-resident
                pl.BlockSpec((1, d), lambda i: (0, 0)),    # b2
            ],
            out_specs=pl.BlockSpec((tm, d), lambda i: (i, 0)),
        ),
        compiler_params=pltpu.CompilerParams(
            dimension_semantics=("parallel",),     # independent token tiles
            vmem_limit_bytes=vmem_limit,
        ),
        cost_estimate=cost,
    )(x, w1, b1, w2, b2)


def residual_forward(x_btd, w1, b1, w2, b2, *, block_tokens=256):
    """Residual(FeedForward) forward. x_btd: [B, T, D]."""
    b, t, d = x_btd.shape
    out = residual_feedforward(x_btd.reshape(b * t, d), w1, b1, w2, b2,
                               block_tokens=block_tokens)
    return out.reshape(b, t, d)


if __name__ == "__main__":
    key = jax.random.PRNGKey(0)
    # Small but lane-dense shapes (D, H multiples of 128) so vregs/stores are
    # unmasked and the tiled path is representative.
    B, T, D, H = 2, 8, 128, 256

    k_x, k_w1, k_b1, k_w2, k_b2 = jax.random.split(key, 5)
    x = jax.random.normal(k_x, (B, T, D), dtype=jnp.float32)
    w1 = jax.random.normal(k_w1, (D, H), dtype=jnp.float32) * 0.02
    b1 = jax.random.normal(k_b1, (1, H), dtype=jnp.float32) * 0.02
    w2 = jax.random.normal(k_w2, (H, D), dtype=jnp.float32) * 0.02
    b2 = jax.random.normal(k_b2, (1, D), dtype=jnp.float32) * 0.02

    # Plain-JAX reference for fn(x) + x (same GELU flavor as the kernel).
    x2 = x.reshape(-1, D)
    ref = (jax.nn.gelu(x2 @ w1 + b1) @ w2 + b2 + x2).reshape(B, T, D)

    # 1) Default tile (grid collapses to 1 at these small token counts).
    out = residual_forward(x, w1, b1, w2, b2)
    jax.block_until_ready(out)
    assert out.shape == x.shape and out.dtype == x.dtype
    assert jnp.allclose(out, ref, atol=1e-4, rtol=1e-4)

    # 2) Force multi-step token tiling (grid=2) to exercise the pipelined path.
    out_tiled = residual_forward(x, w1, b1, w2, b2, block_tokens=8)
    jax.block_until_ready(out_tiled)
    assert jnp.allclose(out_tiled, ref, atol=1e-4, rtol=1e-4)

    # 3) bf16 activation/weight path (native MXU operands, f32 accumulate).
    out_bf16 = residual_forward(x.astype(jnp.bfloat16), w1.astype(jnp.bfloat16),
                                b1.astype(jnp.bfloat16), w2.astype(jnp.bfloat16),
                                b2.astype(jnp.bfloat16))
    jax.block_until_ready(out_bf16)
    assert out_bf16.dtype == jnp.bfloat16
    assert jnp.allclose(out_bf16.astype(jnp.float32), ref, atol=0.1, rtol=0.1)

    print("KERNEL_OK")
</pallas_src>

<mosaic_0001>
module attributes {stable_mosaic.version = 11 : i64} {
  func.func @_residual_ff_kernel(%arg0: i32, %arg1: memref<16x128xf32, #tpu.memory_space<vmem>>, %arg2: memref<128x256xf32, #tpu.memory_space<vmem>>, %arg3: memref<1x256xf32, #tpu.memory_space<vmem>>, %arg4: memref<256x128xf32, #tpu.memory_space<vmem>>, %arg5: memref<1x128xf32, #tpu.memory_space<vmem>>, %arg6: memref<16x128xf32, #tpu.memory_space<vmem>>) attributes {dimension_semantics = [#tpu.dimension_semantics<parallel>], iteration_bounds = array<i64: 1>, scalar_prefetch = 0 : i64, scratch_operands = 0 : i64, tpu.core_type = #tpu.core_type<tc>, window_params = [{transform_indices = @transform_0, window_bounds = array<i64: 16, 128>}, {pipeline_mode = #tpu.pipeline_mode<synchronous>, transform_indices = @transform_1, window_bounds = array<i64: 128, 256>}, {pipeline_mode = #tpu.pipeline_mode<synchronous>, transform_indices = @transform_2, window_bounds = array<i64: 1, 256>}, {pipeline_mode = #tpu.pipeline_mode<synchronous>, transform_indices = @transform_3, window_bounds = array<i64: 256, 128>}, {pipeline_mode = #tpu.pipeline_mode<synchronous>, transform_indices = @transform_4, window_bounds = array<i64: 1, 128>}, {transform_indices = @transform_5, window_bounds = array<i64: 16, 128>}]} {
    %c0 = arith.constant 0 : index
    %c0_0 = arith.constant 0 : index
    %0 = vector.load %arg1[%c0, %c0_0] : memref<16x128xf32, #tpu.memory_space<vmem>>, vector<16x128xf32>
    %c0_1 = arith.constant 0 : index
    %c0_2 = arith.constant 0 : index
    %1 = vector.load %arg2[%c0_1, %c0_2] : memref<128x256xf32, #tpu.memory_space<vmem>>, vector<128x256xf32>
    %cst = arith.constant dense<0.000000e+00> : vector<16x256xf32>
    %2 = tpu.matmul %0, %1, %cst {dimension_numbers = #tpu.dot_dimension_numbers<[1], [0], [0], [1], [0, 0, 1, 1], [], []>} : vector<16x128xf32>, vector<128x256xf32>, vector<16x256xf32> -> vector<16x256xf32>
    %c0_3 = arith.constant 0 : index
    %c0_4 = arith.constant 0 : index
    %3 = vector.load %arg3[%c0_3, %c0_4] : memref<1x256xf32, #tpu.memory_space<vmem>>, vector<1x256xf32>
    %4 = vector.broadcast %3 : vector<1x256xf32> to vector<16x256xf32>
    %5 = arith.addf %2, %4 : vector<16x256xf32>
    %6 = arith.mulf %5, %5 : vector<16x256xf32>
    %7 = arith.mulf %5, %6 : vector<16x256xf32>
    %cst_5 = arith.constant 4.471500e-02 : f32
    %8 = vector.broadcast %cst_5 : f32 to vector<16x256xf32>
    %9 = arith.mulf %8, %7 : vector<16x256xf32>
    %10 = arith.addf %5, %9 : vector<16x256xf32>
    %cst_6 = arith.constant 0.797884583 : f32
    %11 = vector.broadcast %cst_6 : f32 to vector<16x256xf32>
    %12 = arith.mulf %11, %10 : vector<16x256xf32>
    %13 = math.tanh %12 : vector<16x256xf32>
    %cst_7 = arith.constant 1.000000e+00 : f32
    %14 = vector.broadcast %cst_7 : f32 to vector<16x256xf32>
    %15 = arith.addf %14, %13 : vector<16x256xf32>
    %cst_8 = arith.constant 5.000000e-01 : f32
    %16 = vector.broadcast %cst_8 : f32 to vector<16x256xf32>
    %17 = arith.mulf %16, %15 : vector<16x256xf32>
    %18 = arith.mulf %5, %17 : vector<16x256xf32>
    %c0_9 = arith.constant 0 : index
    %c0_10 = arith.constant 0 : index
    %19 = vector.load %arg4[%c0_9, %c0_10] : memref<256x128xf32, #tpu.memory_space<vmem>>, vector<256x128xf32>
    %cst_11 = arith.constant dense<0.000000e+00> : vector<16x128xf32>
    %20 = tpu.matmul %18, %19, %cst_11 {dimension_numbers = #tpu.dot_dimension_numbers<[1], [0], [0], [1], [0, 0, 1, 1], [], []>} : vector<16x256xf32>, vector<256x128xf32>, vector<16x128xf32> -> vector<16x128xf32>
    %c0_12 = arith.constant 0 : index
    %c0_13 = arith.constant 0 : index
    %21 = vector.load %arg5[%c0_12, %c0_13] : memref<1x128xf32, #tpu.memory_space<vmem>>, vector<1x128xf32>
    %22 = vector.broadcast %21 : vector<1x128xf32> to vector<16x128xf32>
    %23 = arith.addf %20, %22 : vector<16x128xf32>
    %24 = arith.addf %23, %0 : vector<16x128xf32>
    %c0_14 = arith.constant 0 : index
    %c0_15 = arith.constant 0 : index
    %25 = vector.load %arg6[%c0_14, %c0_15] : memref<16x128xf32, #tpu.memory_space<vmem>>, vector<16x128xf32>
    tpu.vector_store %arg6[%c0_14, %c0_15], %24 {strides = array<i32>} : memref<16x128xf32, #tpu.memory_space<vmem>>, vector<16x128xf32>,
    return
  }
  func.func @transform_0(%arg0: i32) -> (i32, i32) {
    %c0_i32 = arith.constant 0 : i32
    %c0_i32_0 = arith.constant 0 : i32
    return %arg0, %c0_i32 : i32, i32
  }
  func.func @transform_1(%arg0: i32) -> (i32, i32) {
    %c0_i32 = arith.constant 0 : i32
    %c0_i32_0 = arith.constant 0 : i32
    %c0_i32_1 = arith.constant 0 : i32
    return %c0_i32, %c0_i32_0 : i32, i32
  }
  func.func @transform_2(%arg0: i32) -> (i32, i32) {
    %c0_i32 = arith.constant 0 : i32
    %c0_i32_0 = arith.constant 0 : i32
    %c0_i32_1 = arith.constant 0 : i32
    return %c0_i32, %c0_i32_0 : i32, i32
  }
  func.func @transform_3(%arg0: i32) -> (i32, i32) {
    %c0_i32 = arith.constant 0 : i32
    %c0_i32_0 = arith.constant 0 : i32
    %c0_i32_1 = arith.constant 0 : i32
    return %c0_i32, %c0_i32_0 : i32, i32
  }
  func.func @transform_4(%arg0: i32) -> (i32, i32) {
    %c0_i32 = arith.constant 0 : i32
    %c0_i32_0 = arith.constant 0 : i32
    %c0_i32_1 = arith.constant 0 : i32
    return %c0_i32, %c0_i32_0 : i32, i32
  }
  func.func @transform_5(%arg0: i32) -> (i32, i32) {
    %c0_i32 = arith.constant 0 : i32
    %c0_i32_0 = arith.constant 0 : i32
    return %arg0, %c0_i32 : i32, i32
  }
}

</mosaic_0001>

<bundles_post_ra>
// kernel: tpu_custom_call.1
= control target key start
LH: loop header
LB: loop body
LE: loop exit
PB: predicated region body
PF: predicated region fallthrough
CT: control target
= control target key end

     0   :  { %10 = vsyncpa [#allocation3], 0  ;;  %s683_s0 = inlined_call_operand.hbm [shape: f32[16,128], index: 0, kind: input, shape index: {}]   ;;  %s684_s1 = inlined_call_operand.hbm [shape: f32[128,256], index: 1, kind: input, shape index: {}]   ;;  %s685_s2 = inlined_call_operand.vmem [shape: f32[1,256], index: 2, kind: input, shape index: {}]   ;;  %s686_s3 = inlined_call_operand.hbm [shape: f32[256,128], index: 3, kind: input, shape index: {}]   ;;  %s687_s4 = inlined_call_operand.vmem [shape: f32[1,128], index: 4, kind: input, shape index: {}]   ;;  %s688_s5 = inlined_call_operand.hbm [shape: f32[16,128], index: 5, kind: output, shape index: {}]  }
   0x1   :  { %11 = vsyncpa [#allocation6], 0 }
   0x2   :  { %12 = vsyncpa [#allocation4], 0  ;;  %s571_s18 = smov [#allocation5]   ;;  %s477_s22 = scalar_lea.hbm %s684_s1, 4096 }
   0x3   :  { %s30_s19 = sshll.u32 %s571_s18, 4  ;;  %p478_p0 = scmp.ne.s32.totalorder %s684_s1, %s477_s22  ;;  %s31_s19 = int_to_ptr.vmem [resolvable:$true] %s30_s19 }
   0x4   :  { %p481_p1 = scmp.lt.u32.totalorder %s477_s22, %s684_s1 }
   0x6   :  { %p483_p2 = pnand %p481_p1, %p478_p0 }
   0x8   :  { %486 = shalt.err (!%p483_p2)
}
   0x9   :  { %s487_s27 = scalar_lea.vmem %s31_s19, 4096  ;;  %p492_p4 = scmp.lt.s32.totalorder %s31_s19, %s31_s19 }
   0xa   :  { %p488_p3 = scmp.ne.s32.totalorder %s31_s19, %s487_s27  ;;  %p493_p5 = scmp.lt.s32.totalorder %s487_s27, %s487_s27 }
   0xc   :  { %p494_p6 = por %p493_p5, %p492_p4 }
   0xe   :  { %p495_p7 = pnand %p494_p6, %p488_p3 }
  0x10   :  { %498 = shalt.err (!%p495_p7)
}
  0x11   :  { %s572_s28 = smov 256   ;;  %s573_s29 = smov 16  }
  0x12   :  { %36 = dma.hbm_to_vmem [thread:$0]  %s684_s1, 4096, %s31_s19, [#allocation6], %s572_s28, %s572_s28, %s573_s29  }
  0x13   :  { %s574_s7 = smov [#allocation2]   ;;  %s499_s11 = scalar_lea.hbm %s683_s0, 256 }
  0x14   :  { %s18_s8 = sshll.u32 %s574_s7, 4  ;;  %p500_p8 = scmp.ne.s32.totalorder %s683_s0, %s499_s11  ;;  %s19_s8 = int_to_ptr.vmem [resolvable:$true] %s18_s8 }
  0x15   :  { %p503_p9 = scmp.lt.u32.totalorder %s499_s11, %s683_s0 }
  0x17   :  { %p505_p10 = pnand %p503_p9, %p500_p8 }
  0x19   :  { %508 = shalt.err (!%p505_p10)
}
  0x1a   :  { %s509_s16 = scalar_lea.vmem %s19_s8, 256  ;;  %p514_p12 = scmp.lt.s32.totalorder %s19_s8, %s19_s8 }
  0x1b   :  { %p510_p11 = scmp.ne.s32.totalorder %s19_s8, %s509_s16  ;;  %p515_p13 = scmp.lt.s32.totalorder %s509_s16, %s509_s16 }
  0x1d   :  { %p516_p0 = por %p515_p13, %p514_p12 }
  0x1f   :  { %p517_p1 = pnand %p516_p0, %p510_p11 }
  0x21   :  { %520 = shalt.err (!%p517_p1)
}
  0x22   :  { %s575_s1 = smov 128   ;;  %s576_s17 = smov 8  }
  0x23   :  { %24 = dma.hbm_to_vmem [thread:$0]  %s683_s0, 256, %s19_s8, [#allocation3], %s575_s1, %s575_s1, %s576_s17  }
  0x24   :  { %s577_s20 = smov [#allocation7]   ;;  %s521_s24 = scalar_lea.hbm %s686_s3, 4096 }
  0x25   :  { %s44_s21 = sshll.u32 %s577_s20, 4  ;;  %p522_p2 = scmp.ne.s32.totalorder %s686_s3, %s521_s24  ;;  %s45_s21 = int_to_ptr.vmem [resolvable:$true] %s44_s21 }
  0x26   :  { %p525_p3 = scmp.lt.u32.totalorder %s521_s24, %s686_s3 }
  0x28   :  { %p527_p4 = pnand %p525_p3, %p522_p2 }
  0x2a   :  { %530 = shalt.err (!%p527_p4)
}
  0x2b   :  { %s531_s29 = scalar_lea.vmem %s45_s21, 4096  ;;  %p536_p6 = scmp.lt.s32.totalorder %s45_s21, %s45_s21 }
  0x2c   :  { %p532_p5 = scmp.ne.s32.totalorder %s45_s21, %s531_s29  ;;  %p537_p7 = scmp.lt.s32.totalorder %s531_s29, %s531_s29 }
  0x2e   :  { %p538_p8 = por %p537_p7, %p536_p6 }
  0x30   :  { %p539_p9 = pnand %p538_p8, %p532_p5 }
  0x32   :  { %542 = shalt.err (!%p539_p9)
}
  0x33   :  { %50 = dma.hbm_to_vmem [thread:$0]  %s686_s3, 4096, %s45_s21, [#allocation6], %s575_s1, %s575_s1, %s576_s17  }
  0x34   :  { %565 = dma.done.wait [#allocation3], 256  }
  0x35   :  { %566 = vsyncadd [#allocation3], 4294967040 }
  0x36   :  { %567 = dma.done.wait [#allocation6], 8192  }
  0x37   :  { %568 = vsyncadd [#allocation6], 4294959104  ;;  %v578_v0 = vmov 0.0   ;;  %v65_v1 = vld [vmem:[#allocation5 + $0x8] sm:$0xff]  ;;  %v67_v2 = vld [vmem:[#allocation5 + $0x18] sm:$0xff]  ;;  %s579_s8 = smov [#allocation8]  }
  0x38   :  { %172 = vmatprep.mubr.f32.mxu0 %v578_v0  ;;  %v64_v3 = vld [vmem:[#allocation5] sm:$0xff]  ;;  %v396_v4 = vpack.c.bf16 %v67_v2, %v65_v1  ;;  %v66_v5 = vld [vmem:[#allocation5 + $0x10] sm:$0xff]  ;;  %v69_v6 = vld [vmem:[#allocation5 + $0x28] sm:$0xff]  ;;  %s344_s9 = sshll.u32 %s579_s8, 4  ;;  %s345_s9 = int_to_ptr.vmem [resolvable:$true] %s344_s9 }
  0x39   :  { %v71_v7 = vld [vmem:[#allocation5 + $0x38] sm:$0xff]  ;;  %v398_v8 = vpack.c.bf16 %v66_v5, %v64_v3  ;;  %v68_v10 = vld [vmem:[#allocation5 + $0x20] sm:$0xff]  ;;  %v70_v11 = vld [vmem:[#allocation5 + $0x30] sm:$0xff]  ;;  %s543_s10 = scalar_lea.vmem %s345_s9, 256  ;;  %p548_p11 = scmp.lt.s32.totalorder %s345_s9, %s345_s9 }
  0x3a   :  { %v400_v9 = vpack.c.bf16 %v71_v7, %v69_v6  ;;  %v73_v12 = vld [vmem:[#allocation5 + $0x48] sm:$0xff]  ;;  %397 = vmatprep.subr.bf16.mxu0 %v396_v4  ;;  %v75_v13 = vld [vmem:[#allocation5 + $0x58] sm:$0xff]  ;;  %v402_v14 = vpack.c.bf16 %v70_v11, %v68_v10  ;;  %v72_v16 = vld [vmem:[#allocation5 + $0x40] sm:$0xff]  ;;  %p544_p10 = scmp.ne.s32.totalorder %s345_s9, %s543_s10  ;;  %p549_p12 = scmp.lt.s32.totalorder %s543_s10, %s543_s10 }
  0x3b   :  { %399 = vmatpush1.bf16.msra.mxu0 %v398_v8  ;;  %v404_v15 = vpack.c.bf16 %v75_v13, %v73_v12  ;;  %v74_v17 = vld [vmem:[#allocation5 + $0x50] sm:$0xff]  ;;  %v77_v18 = vld [vmem:[#allocation5 + $0x68] sm:$0xff]  ;;  %v79_v19 = vld [vmem:[#allocation5 + $0x78] sm:$0xff] }
  0x3c   :  { %401 = vmatprep.subr.bf16.mxu0 %v400_v9  ;;  %v406_v20 = vpack.c.bf16 %v74_v17, %v72_v16  ;;  %v408_v21 = vpack.c.bf16 %v79_v19, %v77_v18  ;;  %v76_v22 = vld [vmem:[#allocation5 + $0x60] sm:$0xff]  ;;  %v78_v23 = vld [vmem:[#allocation5 + $0x70] sm:$0xff]  ;;  %v81_v24 = vld [vmem:[#allocation5 + $0x88] sm:$0xff]  ;;  %p550_p13 = por %p549_p12, %p548_p11 }
  0x3d   :  { %v83_v25 = vld [vmem:[#allocation5 + $0x98] sm:$0xff]  ;;  %v410_v26 = vpack.c.bf16 %v78_v23, %v76_v22  ;;  %v80_v28 = vld [vmem:[#allocation5 + $0x80] sm:$0xff]  ;;  %v82_v29 = vld [vmem:[#allocation5 + $0x90] sm:$0xff] }
  0x3e   :  { %v412_v27 = vpack.c.bf16 %v83_v25, %v81_v24  ;;  %v85_v30 = vld [vmem:[#allocation5 + $0xa8] sm:$0xff]  ;;  %v87_v31 = vld [vmem:[#allocation5 + $0xb8] sm:$0xff]  ;;  %v414_v32 = vpack.c.bf16 %v82_v29, %v80_v28  ;;  %v84_v34 = vld [vmem:[#allocation5 + $0xa0] sm:$0xff]  ;;  %p551_p0 = pnand %p550_p13, %p544_p10 }
  0x3f   :  { %403 = vmatpush1.bf16.msra.mxu0 %v402_v14  ;;  %v416_v33 = vpack.c.bf16 %v87_v31, %v85_v30  ;;  %v86_v35 = vld [vmem:[#allocation5 + $0xb0] sm:$0xff]  ;;  %v89_v36 = vld [vmem:[#allocation5 + $0xc8] sm:$0xff]  ;;  %v91_v37 = vld [vmem:[#allocation5 + $0xd8] sm:$0xff] }
  0x40   :  { %405 = vmatprep.subr.bf16.mxu0 %v404_v15  ;;  %v418_v38 = vpack.c.bf16 %v86_v35, %v84_v34  ;;  %v420_v39 = vpack.c.bf16 %v91_v37, %v89_v36  ;;  %v88_v40 = vld [vmem:[#allocation5 + $0xc0] sm:$0xff]  ;;  %v90_v41 = vld [vmem:[#allocation5 + $0xd0] sm:$0xff]  ;;  %v93_v42 = vld [vmem:[#allocation5 + $0xe8] sm:$0xff]  ;;  %v98_v35 = vlaneseq }
  0x41   :  { %v95_v43 = vld [vmem:[#allocation5 + $0xf8] sm:$0xff]  ;;  %v422_v44 = vpack.c.bf16 %v90_v41, %v88_v40  ;;  %v92_v46 = vld [vmem:[#allocation5 + $0xe0] sm:$0xff]  ;;  %v94_v47 = vld [vmem:[#allocation5 + $0xf0] sm:$0xff] }
  0x42   :  { %v424_v45 = vpack.c.bf16 %v95_v43, %v93_v42  ;;  %v426_v48 = vpack.c.bf16 %v94_v47, %v92_v46  ;;  %v653_v49 = vld [vmem:[#allocation2] sm:$0xff]  ;;  %v657_v50 = vld [vmem:[#allocation2 + $0x8] sm:$0xff]  ;;  %v237_v51 = vld [vmem:[#allocation7 + $0x80] sm:$0xff]  ;;  %v99_v36 = vshrl.u32 %v98_v35, 7 }
  0x43   :  { %407 = vmatpush1.bf16.msra.mxu0 %v406_v20  ;;  %v238_v52 = vld [vmem:[#allocation7 + $0x88] sm:$0xff]  ;;  %v221_v54 = vld [vmem:[#allocation7] sm:$0xff]  ;;  %v239_v57 = vld [vmem:[#allocation7 + $0x90] sm:$0xff] }
  0x44   :  { %409 = vmatprep.subr.bf16.mxu0 %v408_v21  ;;  %v428_v53 = vpack.c.bf16 %v238_v52, %v237_v51  ;;  %v222_v55 = vld [vmem:[#allocation7 + $0x8] sm:$0xff]  ;;  %v240_v58 = vld [vmem:[#allocation7 + $0x98] sm:$0xff]  ;;  %v223_v60 = vld [vmem:[#allocation7 + $0x10] sm:$0xff]  ;;  %v100_v37 = vsub.s32 0, %v99_v36 }
  0x45   :  { %v430_v56 = vpack.c.bf16 %v222_v55, %v221_v54  ;;  %v432_v59 = vpack.c.bf16 %v240_v58, %v239_v57  ;;  %v224_v61 = vld [vmem:[#allocation7 + $0x18] sm:$0xff]  ;;  %v241_v63 = vld [vmem:[#allocation7 + $0xa0] sm:$0xff]  ;;  %v226_v3 = vld [vmem:[#allocation7 + $0x28] sm:$0xff] }
  0x46   :  { %429 = vmatprep.subr.bf16.mxu1 %v428_v53  ;;  %v434_v62 = vpack.c.bf16 %v224_v61, %v223_v60  ;;  %v225_v2 = vld [vmem:[#allocation7 + $0x20] sm:$0xff]  ;;  %v243_v5 = vld [vmem:[#allocation7 + $0xb0] sm:$0xff]  ;;  %v244_v6 = vld [vmem:[#allocation7 + $0xb8] sm:$0xff] }
  0x47   :  { %411 = vmatpush1.bf16.msra.mxu0 %v410_v26  ;;  %431 = vmatpush3.bf16.msra.mxu1 %v430_v56  ;;  %v438_v4 = vpack.c.bf16 %v226_v3, %v225_v2  ;;  %v440_v7 = vpack.c.bf16 %v244_v6, %v243_v5  ;;  %v227_v8 = vld [vmem:[#allocation7 + $0x30] sm:$0xff]  ;;  %v228_v9 = vld [vmem:[#allocation7 + $0x38] sm:$0xff]  ;;  %v245_v11 = vld [vmem:[#allocation7 + $0xc0] sm:$0xff] }
  0x48   :  { %413 = vmatprep.subr.bf16.mxu0 %v412_v27  ;;  %433 = vmatprep.subr.bf16.mxu1 %v432_v59  ;;  %v442_v10 = vpack.c.bf16 %v228_v9, %v227_v8  ;;  %v246_v12 = vld [vmem:[#allocation7 + $0xc8] sm:$0xff]  ;;  %v229_v14 = vld [vmem:[#allocation7 + $0x40] sm:$0xff]  ;;  %v247_v17 = vld [vmem:[#allocation7 + $0xd0] sm:$0xff] }
  0x49   :  { %v444_v13 = vpack.c.bf16 %v246_v12, %v245_v11  ;;  %v230_v15 = vld [vmem:[#allocation7 + $0x48] sm:$0xff]  ;;  %v248_v18 = vld [vmem:[#allocation7 + $0xd8] sm:$0xff]  ;;  %v231_v19 = vld [vmem:[#allocation7 + $0x50] sm:$0xff] }
  0x4a   :  { %v446_v16 = vpack.c.bf16 %v230_v15, %v229_v14  ;;  %v448_v20 = vpack.c.bf16 %v248_v18, %v247_v17  ;;  %v232_v21 = vld [vmem:[#allocation7 + $0x58] sm:$0xff]  ;;  %v249_v22 = vld [vmem:[#allocation7 + $0xe0] sm:$0xff]  ;;  %v250_v23 = vld [vmem:[#allocation7 + $0xe8] sm:$0xff] }
  0x4b   :  { %415 = vmatpush1.bf16.msra.mxu0 %v414_v32  ;;  %435 = vmatpush3.bf16.msra.mxu1 %v434_v62  ;;  %v450_v24 = vpack.c.bf16 %v232_v21, %v231_v19  ;;  %v452_v25 = vpack.c.bf16 %v250_v23, %v249_v22  ;;  %v233_v26 = vld [vmem:[#allocation7 + $0x60] sm:$0xff]  ;;  %v234_v27 = vld [vmem:[#allocation7 + $0x68] sm:$0xff]  ;;  %v251_v28 = vld [vmem:[#allocation7 + $0xf0] sm:$0xff] }
  0x4c   :  { %417 = vmatprep.subr.bf16.mxu0 %v416_v33  ;;  %v252_v29 = vld [vmem:[#allocation7 + $0xf8] sm:$0xff]  ;;  %v454_v30 = vpack.c.bf16 %v234_v27, %v233_v26  ;;  %v235_v32 = vld [vmem:[#allocation7 + $0x70] sm:$0xff] }
  0x4d   :  { %v456_v31 = vpack.c.bf16 %v252_v29, %v251_v28  ;;  %v236_v33 = vld [vmem:[#allocation7 + $0x78] sm:$0xff] }
  0x4e   :  { %v458_v34 = vpack.c.bf16 %v236_v33, %v235_v32 }
  0x4f   :  { %419 = vmatpush1.bf16.msra.mxu0 %v418_v38  ;;  %v96_v38 = vld [vmem:[%s685_s2] sm:$0x3] }
  0x50   :  { %421 = vmatprep.subr.bf16.mxu0 %v420_v39  ;;  %v104_v39 = vsub.s32 1, %v99_v36  ;;  %v101_v40 = vrot.slane %v96_v38, %v100_v37 }
  0x52   :  { %v105_v41 = vrot.slane %v96_v38, %v104_v39 }
  0x53   :  { %423 = vmatpush1.bf16.msra.mxu0 %v422_v44 }
  0x54   :  { %425 = vmatprep.subr.bf16.mxu0 %v424_v45 }
  0x57   :  { %427 = vmatpush1.bf16.msra.mxu0 %v426_v48 }
  0x5a   :  { %173 = vmatmul.mubr.f32.vlgmr.msra.gmra.mrb[0].mxu0 %v653_v49 }
  0x5b   :  { %178 = vmatprep.mubr.f32.mxu0 %v578_v0  ;;  %v242_v0 = vld [vmem:[#allocation7 + $0xa8] sm:$0xff] }
  0x5c   :  { %v436_v1 = vpack.c.bf16 %v242_v0, %v241_v63 }
  0x5e   :  { %179 = vmatmul.mubr.f32.gmra.mrb[2].mxu0 %v657_v50  ;;  %437 = vmatprep.subr.bf16.mxu1 %v436_v1 }
  0x5f   :  { %439 = vmatpush3.bf16.msra.mxu1 %v438_v4 }
  0x60   :  { %441 = vmatprep.subr.bf16.mxu1 %v440_v7 }
  0x63   :  { %443 = vmatpush3.bf16.msra.mxu1 %v442_v10 }
  0x64   :  { %445 = vmatprep.subr.bf16.mxu1 %v444_v13 }
  0x67   :  { %447 = vmatpush3.bf16.msra.mxu1 %v446_v16 }
  0x68   :  { %449 = vmatprep.subr.bf16.mxu1 %v448_v20 }
  0x6b   :  { %451 = vmatpush3.bf16.msra.mxu1 %v450_v24 }
  0x6c   :  { %453 = vmatprep.subr.bf16.mxu1 %v452_v25  ;;  %v357_v25 = vld [vmem:[%s687_s4] ss:$0 sm:$0xff] }
  0x6f   :  { %455 = vmatpush3.bf16.msra.mxu1 %v454_v30 }
  0x70   :  { %457 = vmatprep.subr.bf16.mxu1 %v456_v31 }
  0x73   :  { %459 = vmatpush3.bf16.msra.mxu1 %v458_v34 }
 0x12d   :  { %v174_v42 = vpop.f32.mrb[0].mxu0 }
 0x12e   :  { %v175_v43 = vadd.f32 %v174_v42, %v101_v40  ;;  %v176_v44 = vpop.f32.mrb[1].mxu0 }
 0x12f   :  { %v177_v45 = vadd.f32 %v176_v44, %v105_v41 }
 0x130   :  { %v185_v46 = vmul.f32 %v175_v43, %v175_v43 }
 0x131   :  { %v186_v47 = vmul.f32 %v177_v45, %v177_v45  ;;  %v180_v48 = vpop.f32.mrb[2].mxu0 }
 0x132   :  { %v189_v51 = vmul.f32 %v185_v46, %v175_v43  ;;  %v181_v52 = vadd.f32 %v180_v48, %v101_v40  ;;  %v182_v53 = vpop.f32.mrb[3].mxu0 }
 0x133   :  { %v190_v54 = vmul.f32 %v186_v47, %v177_v45  ;;  %v183_v55 = vadd.f32 %v182_v53, %v105_v41 }
 0x134   :  { %v193_v56 = vmul.f32 0.044715, %v189_v51  ;;  %v187_v57 = vmul.f32 %v181_v52, %v181_v52 }
 0x135   :  { %v188_v58 = vmul.f32 %v183_v55, %v183_v55  ;;  %v194_v59 = vmul.f32 0.044715, %v190_v54 }
 0x136   :  { %v197_v60 = vadd.f32 %v193_v56, %v175_v43  ;;  %v191_v61 = vmul.f32 %v187_v57, %v181_v52 }
 0x137   :  { %v192_v62 = vmul.f32 %v188_v58, %v183_v55  ;;  %v198_v63 = vadd.f32 %v194_v59, %v177_v45 }
 0x138   :  { %v201_v0 = vmul.f32 0.7978846, %v197_v60  ;;  %v195_v1 = vmul.f32 0.044715, %v191_v61 }
 0x139   :  { %v196_v2 = vmul.f32 0.044715, %v192_v62  ;;  %v202_v3 = vmul.f32 0.7978846, %v198_v63 }
 0x13a   :  { %v199_v4 = vadd.f32 %v195_v1, %v181_v52  ;;  %469 = vtanh.f32 %v201_v0 }
 0x13b   :  { %v200_v5 = vadd.f32 %v196_v2, %v183_v55  ;;  %471 = vtanh.f32 %v202_v3 }
 0x13c   :  { %v203_v6 = vmul.f32 0.7978846, %v199_v4 }
 0x13d   :  { %v204_v7 = vmul.f32 0.7978846, %v200_v5 }
 0x13e   :  { %473 = vtanh.f32 %v203_v6 }
 0x13f   :  { %475 = vtanh.f32 %v204_v7 }
 0x144   :  { %v470_v8 = vpop.eup %469 }
 0x145   :  { %v472_v9 = vpop.eup %471  ;;  %v209_v10 = vadd.f32 1.0, %v470_v8 }
 0x146   :  { %v210_v11 = vadd.f32 1.0, %v472_v9 }
 0x147   :  { %v213_v12 = vmul.f32 0.5, %v209_v10 }
 0x148   :  { %v474_v13 = vpop.eup %473  ;;  %v214_v14 = vmul.f32 0.5, %v210_v11 }
 0x149   :  { %v476_v15 = vpop.eup %475  ;;  %v211_v16 = vadd.f32 1.0, %v474_v13  ;;  %v217_v19 = vmul.f32 %v213_v12, %v175_v43 }
 0x14a   :  { %v218_v17 = vmul.f32 %v214_v14, %v177_v45  ;;  %v212_v18 = vadd.f32 1.0, %v476_v15 }
 0x14b   :  { %v215_v20 = vmul.f32 0.5, %v211_v16 }
 0x14c   :  { %324 = vmatprep.mubr.f32.mxu1 %v218_v17  ;;  %v216_v21 = vmul.f32 0.5, %v212_v18 }
 0x14d   :  { %325 = vmatmul.mubr.f32.vlgmr.msra.gmra.mrb[0].mxu1 %v217_v19  ;;  %v219_v23 = vmul.f32 %v215_v20, %v181_v52 }
 0x14e   :  { %v220_v22 = vmul.f32 %v216_v21, %v183_v55 }
 0x150   :  { %329 = vmatprep.mubr.f32.mxu1 %v220_v22 }
 0x151   :  { %330 = vmatmul.mubr.f32.gmra.mrb[2].mxu1 %v219_v23 }
 0x220   :  { %v390_v24 = vpop.f32.mrb[0].mxu1 }
 0x221   :  { %v391_v26 = vpop.f32.mrb[1].mxu1 }
 0x222   :  { %v392_v27 = vadd.f32 %v391_v26, %v390_v24 }
 0x224   :  { %v327_v28 = vadd.f32 %v392_v27, %v357_v25  ;;  %v393_v29 = vpop.f32.mrb[2].mxu1 }
 0x225   :  { %v394_v30 = vpop.f32.mrb[3].mxu1 }
 0x226   :  { %v335_v31 = vadd.f32 %v327_v28, %v653_v49  ;;  %v395_v32 = vadd.f32 %v394_v30, %v393_v29 }
 0x228   :  { %337 = vst [vmem:[#allocation8] sm:$0xff] %v335_v31  ;;  %v332_v33 = vadd.f32 %v395_v32, %v357_v25 }
 0x22a   :  { %v336_v34 = vadd.f32 %v332_v33, %v657_v50 }
 0x22c   :  { %338 = vst [vmem:[#allocation8 + $0x8] sm:$0xff] %v336_v34 }
 0x22d   :  { %554 = shalt.err (!%p551_p0)
}
 0x22e   :  { %s555_s12 = scalar_lea.hbm %s688_s5, 256 }
 0x22f   :  { %p556_p1 = scmp.ne.s32.totalorder %s688_s5, %s555_s12  ;;  %p559_p2 = scmp.lt.u32.totalorder %s555_s12, %s688_s5 }
 0x231   :  { %p561_p3 = pnand %p559_p2, %p556_p1 }
 0x233   :  { %564 = shalt.err (!%p561_p3)
}
 0x234   :  { %350 = dma.vmem_to_hbm [thread:$0]  %s345_s9, 256, %s688_s5, [#allocation4], %s575_s1, %s575_s1, %s576_s17  }
 0x235   :  { %569 = dma.done.wait [#allocation4], 256  }
 0x236   :  { %570 = vsyncadd [#allocation4], 4294967040 }
 0x237   :  { %354 = vsyncpa [#allocation3], 1 }
 0x238   :  { %355 = vsyncpa [#allocation6], 1 }
 0x239   :  { %356 = vsyncpa [#allocation4], 1 }

</bundles_post_ra>
